<compile_context>
chip_gen: v7x
topology: tpu7x:2x2x1
jax: 0.10.0
libtpu: 0.0.40
codegen_flags: <defaults>
</compile_context>

<pallas_src>
import jax
import jax.numpy as jnp
from jax import lax
from jax.experimental import pallas as pl
from jax.experimental.pallas import tpu as pltpu


def _round_up(a, b):
    return ((a + b - 1) // b) * b


def _etm_head_kernel(x_ref, w_ref, b_ref, o_ref):
    # x_ref: (TM, H)   w_ref: (N, H) lane-dense   b_ref: (1, N)   o_ref: (TM, N)
    x = x_ref[...].astype(jnp.float32)
    w = w_ref[...].astype(jnp.float32)
    # Contract over H: (TM, H) x (N, H) -> (TM, N).  The tiny weight transpose
    # goes through the XLU, whose slots are idle in this kernel.
    acc = lax.dot_general(
        x, w,
        dimension_numbers=(((1,), (1,)), ((), ())),
        preferred_element_type=jnp.float32,
    )
    o_ref[...] = (acc + b_ref[...].astype(jnp.float32)).astype(o_ref.dtype)


def etm_head_forward(x, weight, bias):
    """y = x @ weight.T + bias, matching nn.Linear(hidden_size, 2) semantics.

    x:      (..., H)
    weight: (2, H)   float32
    bias:   (2,)     float32
    returns (..., 2) in x.dtype
    """
    orig_shape = x.shape
    H = orig_shape[-1]
    N = weight.shape[0]  # 2

    x2d = x.reshape(-1, H)  # no data copy of the big tensor
    M = x2d.shape[0]

    w2d = weight  # keep (N, H) lane-dense and in f32 (no downcast)
    b2d = bias.reshape(1, N)

    # ---- generation-aware VMEM budget ---------------------------------
    try:
        vmem_cap = pltpu.get_tpu_info().vmem_capacity_bytes
    except Exception:
        vmem_cap = 64 * 1024 * 1024  # conservative fallback
    if vmem_cap <= 64 * 1024 * 1024:          # v7x-class: 64 MiB per TC
        stream_budget = 36 * 1024 * 1024      # total for double-buffered x+out
        vmem_limit = 48 * 1024 * 1024
    else:                                     # v5e / v6e: 128 MiB
        stream_budget = 80 * 1024 * 1024
        vmem_limit = 100 * 1024 * 1024

    # ---- byte-targeted TM, accounting for 128-lane padding -------------
    x_item = jnp.dtype(x.dtype).itemsize
    o_item = x_item
    sub = max(8, 32 // x_item)                # 8 for f32, 16 for bf16, 32 for i8
    h_lanes = _round_up(H, 128)
    # double-buffered x row + double-buffered (lane-padded) output row
    per_row_bytes = 2 * (h_lanes * x_item + 128 * o_item)
    tm_cap = max(sub, (stream_budget // per_row_bytes) // sub * sub)
    TM = min(tm_cap, _round_up(M, sub))
    TM = max(TM, sub)

    grid = (pl.cdiv(M, TM),)

    cost = pl.CostEstimate(
        flops=2 * M * H * N,
        transcendentals=0,
        bytes_accessed=M * H * x_item + M * N * o_item + N * H * 4 + N * 4,
    )

    out = pl.pallas_call(
        _etm_head_kernel,
        out_shape=jax.ShapeDtypeStruct((M, N), x.dtype),
        grid=grid,
        in_specs=[
            pl.BlockSpec((TM, H), lambda i: (i, 0)),   # streamed activations
            pl.BlockSpec((N, H), lambda i: (0, 0)),    # resident lane-dense weight
            pl.BlockSpec((1, N), lambda i: (0, 0)),    # resident bias
        ],
        out_specs=pl.BlockSpec((TM, N), lambda i: (i, 0)),
        compiler_params=pltpu.CompilerParams(
            dimension_semantics=("parallel",),          # lets v7x use both TCs
            vmem_limit_bytes=vmem_limit,
        ),
        cost_estimate=cost,
    )(x2d, w2d, b2d)

    return out.reshape(*orig_shape[:-1], N)


if __name__ == "__main__":
    key = jax.random.PRNGKey(0)
    k_x, k_w, k_b = jax.random.split(key, 3)

    batch, seq, hidden = 2, 8, 32
    out_features = 2

    # Deterministic parameter init (mimics nn.Linear uniform(-1/sqrt(H), 1/sqrt(H))).
    bound = 1.0 / (hidden ** 0.5)
    weight = jax.random.uniform(k_w, (out_features, hidden),
                                minval=-bound, maxval=bound, dtype=jnp.float32)
    bias = jax.random.uniform(k_b, (out_features,),
                              minval=-bound, maxval=bound, dtype=jnp.float32)

    x = jax.random.normal(k_x, (batch, seq, hidden), dtype=jnp.float32)

    y = etm_head_forward(x, weight, bias)
    jax.block_until_ready(y)

    # Reference check against plain JAX.
    y_ref = x @ weight.T + bias
    assert y.shape == (batch, seq, out_features), y.shape
    assert jnp.allclose(y, y_ref, atol=1e-5, rtol=1e-5), "mismatch vs reference"

    print("KERNEL_OK")
</pallas_src>

<mosaic_0001>
module attributes {stable_mosaic.version = 11 : i64} {
  func.func @_etm_head_kernel(%arg0: i32, %arg1: memref<16x32xf32, #tpu.memory_space<vmem>>, %arg2: memref<2x32xf32, #tpu.memory_space<vmem>>, %arg3: memref<1x2xf32, #tpu.memory_space<vmem>>, %arg4: memref<16x2xf32, #tpu.memory_space<vmem>>) attributes {dimension_semantics = [#tpu.dimension_semantics<parallel>], iteration_bounds = array<i64: 1>, scalar_prefetch = 0 : i64, scratch_operands = 0 : i64, tpu.core_type = #tpu.core_type<tc>, window_params = [{transform_indices = @transform_0, window_bounds = array<i64: 16, 32>}, {pipeline_mode = #tpu.pipeline_mode<synchronous>, transform_indices = @transform_1, window_bounds = array<i64: 2, 32>}, {pipeline_mode = #tpu.pipeline_mode<synchronous>, transform_indices = @transform_2, window_bounds = array<i64: 1, 2>}, {transform_indices = @transform_3, window_bounds = array<i64: 16, 2>}]} {
    %c0 = arith.constant 0 : index
    %c0_0 = arith.constant 0 : index
    %0 = vector.load %arg1[%c0, %c0_0] : memref<16x32xf32, #tpu.memory_space<vmem>>, vector<16x32xf32>
    %c0_1 = arith.constant 0 : index
    %c0_2 = arith.constant 0 : index
    %1 = vector.load %arg2[%c0_1, %c0_2] : memref<2x32xf32, #tpu.memory_space<vmem>>, vector<2x32xf32>
    %cst = arith.constant dense<0.000000e+00> : vector<16x2xf32>
    %2 = tpu.matmul %0, %1, %cst {dimension_numbers = #tpu.dot_dimension_numbers<[1], [1], [0], [0], [0, 0, 1, 0], [], []>} : vector<16x32xf32>, vector<2x32xf32>, vector<16x2xf32> -> vector<16x2xf32>
    %c0_3 = arith.constant 0 : index
    %c0_4 = arith.constant 0 : index
    %3 = vector.load %arg3[%c0_3, %c0_4] : memref<1x2xf32, #tpu.memory_space<vmem>>, vector<1x2xf32>
    %4 = vector.broadcast %3 : vector<1x2xf32> to vector<16x2xf32>
    %5 = arith.addf %2, %4 : vector<16x2xf32>
    %c0_5 = arith.constant 0 : index
    %c0_6 = arith.constant 0 : index
    %6 = vector.load %arg4[%c0_5, %c0_6] : memref<16x2xf32, #tpu.memory_space<vmem>>, vector<16x2xf32>
    tpu.vector_store %arg4[%c0_5, %c0_6], %5 {strides = array<i32>} : memref<16x2xf32, #tpu.memory_space<vmem>>, vector<16x2xf32>,
    return
  }
  func.func @transform_0(%arg0: i32) -> (i32, i32) {
    %c0_i32 = arith.constant 0 : i32
    %c0_i32_0 = arith.constant 0 : i32
    return %arg0, %c0_i32 : i32, i32
  }
  func.func @transform_1(%arg0: i32) -> (i32, i32) {
    %c0_i32 = arith.constant 0 : i32
    %c0_i32_0 = arith.constant 0 : i32
    %c0_i32_1 = arith.constant 0 : i32
    return %c0_i32, %c0_i32_0 : i32, i32
  }
  func.func @transform_2(%arg0: i32) -> (i32, i32) {
    %c0_i32 = arith.constant 0 : i32
    %c0_i32_0 = arith.constant 0 : i32
    %c0_i32_1 = arith.constant 0 : i32
    return %c0_i32, %c0_i32_0 : i32, i32
  }
  func.func @transform_3(%arg0: i32) -> (i32, i32) {
    %c0_i32 = arith.constant 0 : i32
    %c0_i32_0 = arith.constant 0 : i32
    return %arg0, %c0_i32 : i32, i32
  }
}

</mosaic_0001>

<bundles_post_ra>
// kernel: tpu_custom_call.1
= control target key start
LH: loop header
LB: loop body
LE: loop exit
PB: predicated region body
PF: predicated region fallthrough
CT: control target
= control target key end

     0   :  { %8 = vsyncpa [#allocation3], 0  ;;  %s170_s12 = smov [#allocation2]   ;;  %s217_s0 = inlined_call_operand.hbm [shape: f32[16,32], index: 0, kind: input, shape index: {}]   ;;  %s218_s1 = inlined_call_operand.vmem [shape: f32[2,32], index: 1, kind: input, shape index: {}]   ;;  %s219_s2 = inlined_call_operand.vmem [shape: f32[1,2], index: 2, kind: input, shape index: {}]   ;;  %s220_s3 = inlined_call_operand.vmem [shape: f32[16,2], index: 3, kind: output, shape index: {}]  }
   0x1   :  { %s14_s13 = sshll.u32 %s170_s12, 4  ;;  %s146_s16 = scalar_lea.hbm %s217_s0, 256  ;;  %s15_s13 = int_to_ptr.vmem [resolvable:$true] %s14_s13 }
   0x2   :  { %p147_p0 = scmp.ne.s32.totalorder %s217_s0, %s146_s16  ;;  %p150_p1 = scmp.lt.u32.totalorder %s146_s16, %s217_s0 }
   0x4   :  { %p152_p2 = pnand %p150_p1, %p147_p0 }
   0x6   :  { %155 = shalt.err (!%p152_p2)
}
   0x7   :  { %s156_s21 = scalar_lea.vmem %s15_s13, 256  ;;  %p161_p4 = scmp.lt.s32.totalorder %s15_s13, %s15_s13 }
   0x8   :  { %p157_p3 = scmp.ne.s32.totalorder %s15_s13, %s156_s21  ;;  %p162_p5 = scmp.lt.s32.totalorder %s156_s21, %s156_s21 }
   0xa   :  { %p163_p6 = por %p162_p5, %p161_p4 }
   0xc   :  { %p164_p7 = pnand %p163_p6, %p157_p3 }
   0xe   :  { %167 = shalt.err (!%p164_p7)
}
   0xf   :  { %s171_s22 = smov 128   ;;  %s172_s23 = smov 8  }
  0x10   :  { %20 = dma.hbm_to_vmem [thread:$0]  %s217_s0, 256, %s15_s13, [#allocation3], %s171_s22, %s171_s22, %s172_s23  }
  0x11   :  { %168 = dma.done.wait [#allocation3], 256  }
  0x12   :  { %169 = vsyncadd [#allocation3], 4294967040  ;;  %vm38_vm0 = vcmask 261120   ;;  %v30_v0 = vld [vmem:[%s218_s1] sm:$0x3]  ;;  %v28_v1 = vld [vmem:[#allocation2] sm:$0xff] }
  0x13   :  { %138 = vmatprep.subr.msk.mxu0 %vm38_vm0, %v30_v0  ;;  %140 = vmatprep.mubr.msk.f32.mxu0 %vm38_vm0, %v28_v1  ;;  %v29_v2 = vld [vmem:[#allocation2 + $0x8] sm:$0xff]  ;;  %v131_v3 = vld [vmem:[%s219_s2] ss:$0 sm:$0xff]  ;;  %vm123_vm1 = vcmask 15360  }
  0x14   :  { %139 = vmatpush3.xpose.msk.msra.mxu0 %vm38_vm0, %v30_v0 }
  0x17   :  { %141 = vmatmul.mubr.msk.f32.vlgmr.msra.gmra.mrb[0].mxu0 %vm38_vm0, %v29_v2 }
  0xea   :  { %v142_v4 = vpop.f32.mrb[0].mxu0 }
  0xeb   :  { %v120_v5 = vadd.f32 %v142_v4, %v131_v3  ;;  %v114_v6 = vpop.f32.mrb[1].mxu0 }
  0xec   :  { %v115_v7 = vadd.f32 %v131_v3, %v114_v6 }
  0xed   :  { %125 = vst.msk [vmem:[%s220_s3 + $0x8] sm:$0xff] %vm123_vm1, %v120_v5 }
  0xee   :  { %124 = vst.msk [vmem:[%s220_s3] sm:$0xff] %vm123_vm1, %v115_v7 }
  0xef   :  { %130 = vsyncpa [#allocation3], 1 }

</bundles_post_ra>
